<compile_context>
chip_gen: v6e
topology: v6e:2x2x1
jax: 0.10.0
libtpu: 0.0.40
codegen_flags: <defaults>
</compile_context>

<pallas_src>
import functools

import jax
import jax.numpy as jnp
from jax.experimental import pallas as pl
from jax.experimental.pallas import tpu as pltpu


_VMEM_LIMIT_BYTES = 48 * 1024 * 1024  # stays under v7x's 64 MiB physical VMEM


def _round_up(v, m):
    return ((v + m - 1) // m) * m


def _pick_tile(n, multiple, cap):
    """Largest t <= cap with t % multiple == 0 and n % t == 0; fallback: n."""
    t = (min(cap, n) // multiple) * multiple
    while t >= multiple:
        if n % t == 0:
            return t
        t -= multiple
    return n  # full extent is always a legal block dim


# ----------------------------- log-softmax kernel ---------------------------

def _log_softmax_kernel(x_ref, o_ref):
    # Row-wise (dim=1), numerically-stable log-softmax.
    x = x_ref[...].astype(jnp.float32)
    m = jnp.max(x, axis=-1, keepdims=True)
    s = x - m
    lse = jnp.log(jnp.sum(jnp.exp(s), axis=-1, keepdims=True))
    o_ref[...] = (s - lse).astype(o_ref.dtype)


def log_softmax_dim1(x, *, row_tile=256):
    n, c = x.shape
    tr = _pick_tile(n, 8, row_tile)
    return pl.pallas_call(
        _log_softmax_kernel,
        out_shape=jax.ShapeDtypeStruct((n, c), x.dtype),
        grid=(n // tr,),
        in_specs=[pl.BlockSpec((tr, c), lambda i: (i, 0))],
        out_specs=pl.BlockSpec((tr, c), lambda i: (i, 0)),
        compiler_params=pltpu.CompilerParams(
            dimension_semantics=("parallel",),
            vmem_limit_bytes=_VMEM_LIMIT_BYTES,
        ),
    )(x)


# ------------------------------- SAGEConv kernel ----------------------------

def _sage_conv_kernel(adj_ref, xn_ref, xs_ref, w_ref, b_ref, o_ref, agg_ref,
                      *, apply_relu):
    # PyG SAGEConv (aggr='mean', root_weight=True, normalize=False):
    #   out = lin_l(mean_{j in N(i)} x_j) + lin_r(x_i)
    # adj_ref : (tm, tk)   bf16   row-normalized mean-aggregation tile
    # xn_ref  : (tk, F_in) bf16   neighbor features (varies with k)
    # xs_ref  : (tm, F_in) bf16   self features (resident across k)
    # w_ref   : (2*F_in, F_out_pad) bf16  stacked [W_l; W_r]
    # b_ref   : (1, F_out_pad) f32
    # agg_ref : (tm, F_in) f32    mean-aggregation accumulator (scratch)
    k = pl.program_id(1)

    @pl.when(k == 0)
    def _init():
        agg_ref[...] = jnp.zeros_like(agg_ref)

    agg_ref[...] += jnp.dot(adj_ref[...], xn_ref[...],
                            preferred_element_type=jnp.float32)

    @pl.when(k == pl.num_programs(1) - 1)
    def _epilogue():
        # Fused matmul: [agg | x_self] @ [[W_l], [W_r]]  (one MXU issue).
        h = jnp.concatenate(
            [agg_ref[...].astype(w_ref.dtype), xs_ref[...]], axis=-1)
        out = jnp.dot(h, w_ref[...], preferred_element_type=jnp.float32)
        out = out + b_ref[...]
        if apply_relu:
            out = jnp.maximum(out, 0.0)
        o_ref[...] = out.astype(o_ref.dtype)


def sage_conv(x, adj, w_l, b_l, w_r, *, apply_relu=False,
              node_tile=256, nbr_tile=256):
    n, f_in = x.shape
    f_out = w_l.shape[1]
    f_out_pad = max(_round_up(f_out, 128), 128)   # lane-dense output

    # Stacked, zero-padded weights / bias (padding columns stay exactly 0).
    w = jnp.concatenate([w_l, w_r], axis=0)                       # (2*F_in, F_out)
    w = jnp.pad(w, ((0, 0), (0, f_out_pad - f_out)))
    b = jnp.pad(b_l.reshape(1, f_out).astype(jnp.float32),
                ((0, 0), (0, f_out_pad - f_out)))

    # Feed the MXU bf16; accumulate in f32 inside the kernel.
    x_bf = x.astype(jnp.bfloat16)
    adj_bf = adj.astype(jnp.bfloat16)
    w_bf = w.astype(jnp.bfloat16)

    tm = _pick_tile(n, 8, node_tile)     # node rows  (sublane axis of adj)
    tk = _pick_tile(n, 128, nbr_tile)    # neighbors  (lane axis of adj)

    out = pl.pallas_call(
        functools.partial(_sage_conv_kernel, apply_relu=apply_relu),
        out_shape=jax.ShapeDtypeStruct((n, f_out_pad), jnp.float32),
        grid_spec=pltpu.PrefetchScalarGridSpec(
            num_scalar_prefetch=0,
            grid=(n // tm, n // tk),
            in_specs=[
                pl.BlockSpec((tm, tk), lambda i, k: (i, k)),            # adj tile
                pl.BlockSpec((tk, f_in), lambda i, k: (k, 0)),          # neighbor x
                pl.BlockSpec((tm, f_in), lambda i, k: (i, 0)),          # self x (k-invariant)
                pl.BlockSpec((2 * f_in, f_out_pad), lambda i, k: (0, 0)),  # stacked W (resident)
                pl.BlockSpec((1, f_out_pad), lambda i, k: (0, 0)),      # bias (resident)
            ],
            out_specs=pl.BlockSpec((tm, f_out_pad), lambda i, k: (i, 0)),
            scratch_shapes=[pltpu.VMEM((tm, f_in), jnp.float32)],
        ),
        compiler_params=pltpu.CompilerParams(
            dimension_semantics=("parallel", "arbitrary"),
            vmem_limit_bytes=_VMEM_LIMIT_BYTES,
        ),
    )(adj_bf, x_bf, x_bf, w_bf, b)
    return out[:, :f_out]


# ------------------------- parameters & module forward ----------------------

def init_graphsage_params(key, features, hidden, classes):
    """Deterministic init matching the shapes implied by __init__."""
    ks = jax.random.split(key, 4)

    def glorot(k, fan_in, fan_out):
        lim = (6.0 / (fan_in + fan_out)) ** 0.5
        return jax.random.uniform(k, (fan_in, fan_out), jnp.float32, -lim, lim)

    return {
        "gat1": {"w_l": glorot(ks[0], features, hidden),
                 "b_l": jnp.zeros((1, hidden), jnp.float32),
                 "w_r": glorot(ks[1], features, hidden)},
        "gat2": {"w_l": glorot(ks[2], hidden, classes),
                 "b_l": jnp.zeros((1, classes), jnp.float32),
                 "w_r": glorot(ks[3], hidden, classes)},
    }


def graphsage_net_forward(params, x, edge_index=2651):
    # `self.convs` is an empty ModuleList -> the SAGEConv/relu/dropout block is
    # dead code; the exact forward semantics are F.log_softmax(x, dim=1).
    convs = ()  # mirrors the empty torch.nn.ModuleList
    for _i, _conv in enumerate(convs):
        pass  # unreachable by construction
    return log_softmax_dim1(x)


# ----------------------------------- main ------------------------------------

if __name__ == "__main__":
    key = jax.random.PRNGKey(0)
    kx, kadj, kparams = jax.random.split(key, 3)

    num_nodes, features, hidden, classes = 512, 128, 128, 8
    x = jax.random.normal(kx, (num_nodes, features), jnp.float32)

    params = init_graphsage_params(kparams, features, hidden, classes)

    # Exact GraphSAGE_Net.forward semantics (log_softmax over dim=1).
    out = jax.block_until_ready(graphsage_net_forward(params, x))
    assert out.shape == (num_nodes, features)
    ref = jax.nn.log_softmax(x, axis=1)
    assert jnp.allclose(out, ref, atol=1e-5), "log_softmax kernel mismatch"

    # Exercise the tiled SAGEConv Pallas kernel for the layers built in
    # __init__ (never reached by the reference forward).
    adj = (jax.random.uniform(kadj, (num_nodes, num_nodes)) > 0.5).astype(jnp.float32)
    deg = jnp.maximum(adj.sum(axis=1, keepdims=True), 1.0)
    adj = adj / deg  # row-normalized mean-aggregation matrix

    def sage_ref(xi, w_l, b_l, w_r, relu=False):
        o = adj @ xi @ w_l + xi @ w_r + b_l
        return jnp.maximum(o, 0.0) if relu else o

    # Layer 1 with the ReLU fused into the kernel epilogue.
    h1 = jax.block_until_ready(
        sage_conv(x, adj, **params["gat1"], apply_relu=True))
    assert h1.shape == (num_nodes, hidden)
    h1_ref = sage_ref(x, **params["gat1"], relu=True)
    assert jnp.allclose(h1, h1_ref, atol=0.1, rtol=0.1), "sage_conv layer-1 mismatch"

    # Layer 2 (no activation).
    h2 = jax.block_until_ready(sage_conv(h1, adj, **params["gat2"]))
    assert h2.shape == (num_nodes, classes)
    h2_ref = sage_ref(h1, **params["gat2"])
    assert jnp.allclose(h2, h2_ref, atol=0.1, rtol=0.1), "sage_conv layer-2 mismatch"

    print("KERNEL_OK")
</pallas_src>

<mosaic_0001>
module attributes {stable_mosaic.version = 11 : i64} {
  func.func @_log_softmax_kernel(%arg0: i32, %arg1: memref<256x128xf32, #tpu.memory_space<vmem>>, %arg2: memref<256x128xf32, #tpu.memory_space<vmem>>) attributes {dimension_semantics = [#tpu.dimension_semantics<parallel>], iteration_bounds = array<i64: 2>, scalar_prefetch = 0 : i64, scratch_operands = 0 : i64, tpu.core_type = #tpu.core_type<tc>, window_params = [{transform_indices = @transform_0, window_bounds = array<i64: 256, 128>}, {transform_indices = @transform_1, window_bounds = array<i64: 256, 128>}]} {
    %c0 = arith.constant 0 : index
    %c0_0 = arith.constant 0 : index
    %0 = vector.load %arg1[%c0, %c0_0] : memref<256x128xf32, #tpu.memory_space<vmem>>, vector<256x128xf32>
    %cst = arith.constant dense<0xFF800000> : vector<256xf32>
    %1 = vector.multi_reduction <maximumf>, %0, %cst [1] : vector<256x128xf32> to vector<256xf32>
    %2 = vector.shape_cast %1 : vector<256xf32> to vector<256x1xf32>
    %3 = vector.broadcast %2 : vector<256x1xf32> to vector<256x128xf32>
    %4 = arith.subf %0, %3 : vector<256x128xf32>
    %5 = math.exp %4 : vector<256x128xf32>
    %cst_1 = arith.constant dense<0.000000e+00> : vector<256xf32>
    %6 = vector.multi_reduction <add>, %5, %cst_1 [1] : vector<256x128xf32> to vector<256xf32>
    %7 = vector.shape_cast %6 : vector<256xf32> to vector<256x1xf32>
    %8 = math.log %7 : vector<256x1xf32>
    %9 = vector.broadcast %8 : vector<256x1xf32> to vector<256x128xf32>
    %10 = arith.subf %4, %9 : vector<256x128xf32>
    %c0_2 = arith.constant 0 : index
    %c0_3 = arith.constant 0 : index
    %11 = vector.load %arg2[%c0_2, %c0_3] : memref<256x128xf32, #tpu.memory_space<vmem>>, vector<256x128xf32>
    tpu.vector_store %arg2[%c0_2, %c0_3], %10 {strides = array<i32>} : memref<256x128xf32, #tpu.memory_space<vmem>>, vector<256x128xf32>,
    return
  }
  func.func @transform_0(%arg0: i32) -> (i32, i32) {
    %c0_i32 = arith.constant 0 : i32
    %c0_i32_0 = arith.constant 0 : i32
    return %arg0, %c0_i32 : i32, i32
  }
  func.func @transform_1(%arg0: i32) -> (i32, i32) {
    %c0_i32 = arith.constant 0 : i32
    %c0_i32_0 = arith.constant 0 : i32
    return %arg0, %c0_i32 : i32, i32
  }
}

</mosaic_0001>

<bundles_post_ra>
// kernel: tpu_custom_call.1
= control target key start
LH: loop header
LB: loop body
LE: loop exit
PB: predicated region body
PF: predicated region fallthrough
CT: control target
= control target key end

     0   :  { %6 = vsyncpa [#allocation3], 0  ;;  %s1395_s0 = inlined_call_operand.hbm [shape: f32[512,128], index: 0, kind: input, shape index: {}]   ;;  %s1396_s1 = inlined_call_operand.hbm [shape: f32[512,128], index: 1, kind: output, shape index: {}]  }
   0x1   :  { %8 = vsyncpa [#allocation3 + $0x1], 0 }
   0x2   :  { %9 = vsyncpa [#allocation4], 0 }
   0x3   :  { %11 = vsyncpa [#allocation4 + $0x1], 0  ;;  %s912_s6 = smov 0   ;;  %s914_s7 = smov 0  }
   0x4   :  { %s916_s8 = smov 0   ;;  %s918_s9 = smov 0  }
   0x5 LB: > { %s933_s10 = sadd.s32 4294967295, %s894_s9   ;;  %s608_s11 = sadd.s32 4294967294, %s894_s9   ;;  %s894_s9 = sphi %s918_s9, %s1411_s9   ;;  %s890_s8 = sphi %s916_s8, %s1410_s8   ;;  %s886_s7 = sphi %s914_s7, %s1409_s7   ;;  %s882_s6 = sphi %s912_s6, %s1408_s6  }
   0x6   : > { %s937_s12 = sadd.s32 1, %s894_s9   ;;  %s24_s13 = sadd.s32 1, %s890_s8 }
   0x7   : > { %s21_s14 = ssub.s32 %s894_s9, %s937_s12  ;;  %p31_p0 = scmp.ne.s32.totalorder %s890_s8, %s886_s7 }
   0x8   : > { %p22_p1 = scmp.eq.s32.totalorder %s21_s14, 0  ;;  %p32_p2 = scmp.eq.s32.totalorder %s894_s9, 0 }
   0x9   : > { %p37_p3 = scmp.ne.s32.totalorder %s886_s7, %s882_s6  ;;  %p38_p4 = scmp.eq.s32.totalorder %s933_s10, 0 }
   0xa   : > { %s949_s15 = scalar_select %p22_p1, %s890_s8, %s24_s13  }
   0xb   : > { %p951_p5 = por %p32_p2, %p31_p0  ;;  %p955_p6 = por %p38_p4, %p37_p3 }
   0xc   : > { %p61_p7 = scmp.eq.s32.totalorder %s933_s10, 1  ;;  %p67_p8 = scmp.eq.s32.totalorder %s608_s11, 1 }
   0xd   : > { %s1400_s17 = scalar_select %p955_p6, 1, 0 }
   0xe   : > { %p636_p10 = scmp.lt.s32.totalorder %s894_s9, 2  ;;  %p962_p11 = por %p61_p7, %p31_p0 }
   0xf   : > { %p966_p12 = por %p67_p8, %p37_p3  ;;  %s87_s20 = sand.u32 1, %s890_s8  }
  0x10   : > { %s1401_s18 = scalar_select %p962_p11, 1, 0 }
  0x11   : > { %s1402_s19 = scalar_select %p966_p12, 1, 0 }
  0x12   : > { %s622_s21 = sshll.u32 %s894_s9, 12  ;;  %s611_s22 = sshll.u32 %s87_s20, 8 }
  0x13   : > { %s975_s25 = scalar_lea.hbm %s1395_s0, %s622_s21  ;;  %s91_s26 = scalar_lea.vmem [#allocation2], %s611_s22 }
  0x14   : > { %s98_s27 = sshll.u32 %s91_s26, 4  ;;  %p979_p13 = pnand %p636_p10, %p951_p5  ;;  %s983_s27 = int_to_ptr.vmem [resolvable:$true] %s98_s27 }
  0x15   : > { %s985_s29 = scalar_lea.sflag [#allocation3], %s87_s20  ;;  %s802_s30 = scalar_lea.hbm %s975_s25, 4096 }
  0x16   : > { %p803_p0 = scmp.ne.s32.totalorder %s975_s25, %s802_s30  ;;  %p804_p1 = pneg %p979_p13 }
  0x17   : > { %s807_s4 = scalar_lea.hbm %s1395_s0, 8192  ;;  %p808_p4 = scmp.lt.s32.totalorder %s975_s25, %s1395_s0 }
  0x18   : > { %p805_p2 = pnand %p804_p1, %p803_p0  ;;  %p809_p5 = scmp.lt.s32.totalorder %s807_s4, %s802_s30 }
  0x1a   : > { %p806_p3 = pneg %p805_p2  ;;  %p810_p7 = por %p809_p5, %p808_p4 }
  0x1c   : > { %p811_p8 = pnand %p810_p7, %p806_p3 }
  0x1e   : > { %814 = shalt.err (!%p811_p8)
}
  0x1f   : > { %s815_s13 = scalar_lea.vmem %s983_s27, 4096  ;;  %s896_s14 = smov [#allocation2]  }
  0x20   : > { %p816_p10 = scmp.ne.s32.totalorder %s983_s27, %s815_s13  ;;  %s820_s16 = sshll.u32 %s896_s14, 4  ;;  %s821_s16 = int_to_ptr.vmem [resolvable:$false] %s820_s16 }
  0x21   : > { %s822_s20 = scalar_lea.vmem %s821_s16, 8192  ;;  %p823_p2 = scmp.lt.s32.totalorder %s983_s27, %s821_s16 }
  0x22   : > { %p818_p9 = pnand %p816_p10, %p804_p1  ;;  %p824_p12 = scmp.lt.s32.totalorder %s822_s20, %s815_s13 }
  0x24   : > { %p819_p0 = pneg %p818_p9  ;;  %p825_p11 = por %p824_p12, %p823_p2 }
  0x26   : > { %p826_p6 = pnand %p825_p11, %p819_p0 }
  0x28   : > { %829 = shalt.err (!%p826_p6)
}
  0x29   : > { %s897_s21 = smov 128   ;;  %s898_s22 = smov 8  }
  0x2a   : > { %631 = dma.hbm_to_vmem [thread:$0]  (!%p979_p13), %s975_s25, 4096, %s983_s27, %s985_s29, %s897_s21, %s897_s21, %s898_s22  }
  0x2b   : > { %p614_p9 = scmp.ge.s32.totalorder %s894_s9, 1  ;;  %p106_p1 = scmp.lt.s32.totalorder %s894_s9, 3 }
  0x2d   : > { %p107_p3 = pnand %p614_p9, %p106_p1 }
  0x2e   : > { %s1009_s23 = sand.u32 (!%p107_p3), 1, %s886_s7   ;;  %p1404_p6 = scmp.ne.s32.totalorder (!%p107_p3), %s1400_s17, 0 }
  0x2f   : > { %110 = sbr.rel (%p107_p3) target bundleno = 444 (0x1bc), region = 24  ;;  %s615_s24 = sshll.u32 (!%p107_p3), %s1009_s23, 8 }
  0x30   : > { %s113_s26 = scalar_lea.sflag (!%p107_p3), [#allocation3], %s1009_s23  ;;  %s1015_s30 = scalar_lea.vmem (!%p107_p3), [#allocation2], %s615_s24 }
  0x34   : > { %873 = dma.done.wait (%p1404_p6), %s113_s26, 4096  }
  0x35   : > { %875 = vsyncadd (%p1404_p6), %s113_s26, 4294963200  ;;  %v1022_v0 = vld [vmem:[%s1015_s30] sm:$0xff]  ;;  %v1025_v1 = vld [vmem:[%s1015_s30 + $0x10] sm:$0xff]  ;;  %s1280_s17 = scalar_lea.vmem [#allocation5], %s615_s24  ;;  %s623_s25 = sshll.u32 %s933_s10, 12 }
  0x36   : > { %169 = vmax.xlane.f32.xlu0 %v1022_v0  ;;  %173 = vmax.xlane.f32.xlu1 %v1025_v1  ;;  %v1030_v2 = vld [vmem:[%s1015_s30 + $0x8] sm:$0xff]  ;;  %v1033_v3 = vld [vmem:[%s1015_s30 + $0x18] sm:$0xff]  ;;  %v1038_v4 = vld [vmem:[%s1015_s30 + $0x20] sm:$0xff]  ;;  %s535_s27 = sshll.u32 %s1280_s17, 4  ;;  %s1348_s2 = scalar_lea.hbm %s1396_s1, %s623_s25  ;;  %s1350_s27 = int_to_ptr.vmem [resolvable:$true] %s535_s27 }
  0x37   : > { %v1041_v5 = vld [vmem:[%s1015_s30 + $0x28] sm:$0xff]  ;;  %v1046_v6 = vld [vmem:[%s1015_s30 + $0x30] sm:$0xff]  ;;  %v1049_v7 = vld [vmem:[%s1015_s30 + $0x38] sm:$0xff]  ;;  %s522_s10 = scalar_lea.sflag [#allocation4], %s1009_s23  ;;  %s830_s3 = scalar_lea.vmem %s1350_s27, 4096 }
  0x38   : > { %v1054_v8 = vld [vmem:[%s1015_s30 + $0x40] sm:$0xff]  ;;  %v1057_v9 = vld [vmem:[%s1015_s30 + $0x48] sm:$0xff]  ;;  %v1062_v10 = vld [vmem:[%s1015_s30 + $0x50] sm:$0xff]  ;;  %p831_p11 = scmp.ne.s32.totalorder %s1350_s27, %s830_s3  ;;  %p1405_p12 = scmp.ne.s32.totalorder %s1401_s18, 0 }
  0x39   : > { %v1065_v11 = vld [vmem:[%s1015_s30 + $0x58] sm:$0xff]  ;;  %v1070_v12 = vld [vmem:[%s1015_s30 + $0x60] sm:$0xff]  ;;  %v1073_v13 = vld [vmem:[%s1015_s30 + $0x68] sm:$0xff]  ;;  %s899_s4 = smov [#allocation5]  }
  0x3a   : > { %171 = vmax.xlane.f32.xlu0 %v1030_v2  ;;  %175 = vmax.xlane.f32.xlu1 %v1033_v3  ;;  %v1078_v14 = vld [vmem:[%s1015_s30 + $0x70] sm:$0xff]  ;;  %v1081_v15 = vld [vmem:[%s1015_s30 + $0x78] sm:$0xff]  ;;  %v1086_v16 = vld [vmem:[%s1015_s30 + $0x80] sm:$0xff]  ;;  %p832_p13 = pnand %p831_p11, %p1405_p12  ;;  %s834_s5 = sshll.u32 %s899_s4, 4  ;;  %s835_s5 = int_to_ptr.vmem [resolvable:$false] %s834_s5 }
  0x3b   : > { %v1089_v17 = vld [vmem:[%s1015_s30 + $0x88] sm:$0xff]  ;;  %v1094_v18 = vld [vmem:[%s1015_s30 + $0x90] sm:$0xff]  ;;  %v1097_v19 = vld [vmem:[%s1015_s30 + $0x98] sm:$0xff]  ;;  %s836_s11 = scalar_lea.vmem %s835_s5, 8192  ;;  %p837_p5 = scmp.lt.s32.totalorder %s1350_s27, %s835_s5 }
  0x3c   : > { %v1102_v20 = vld [vmem:[%s1015_s30 + $0xa0] sm:$0xff]  ;;  %v1105_v21 = vld [vmem:[%s1015_s30 + $0xa8] sm:$0xff]  ;;  %v1110_v22 = vld [vmem:[%s1015_s30 + $0xb0] sm:$0xff]  ;;  %p833_p4 = pneg %p832_p13  ;;  %p838_p7 = scmp.lt.s32.totalorder %s836_s11, %s830_s3 }
  0x3d   : > { %v1113_v23 = vld [vmem:[%s1015_s30 + $0xb8] sm:$0xff]  ;;  %v1118_v24 = vld [vmem:[%s1015_s30 + $0xc0] sm:$0xff]  ;;  %v1121_v25 = vld [vmem:[%s1015_s30 + $0xc8] sm:$0xff] }
  0x3e   : > { %177 = vmax.xlane.f32.xlu0 %v1038_v4  ;;  %179 = vmax.xlane.f32.xlu1 %v1041_v5  ;;  %v1126_v26 = vld [vmem:[%s1015_s30 + $0xd0] sm:$0xff]  ;;  %v1129_v27 = vld [vmem:[%s1015_s30 + $0xd8] sm:$0xff]  ;;  %v1134_v28 = vld [vmem:[%s1015_s30 + $0xe0] sm:$0xff]  ;;  %p839_p8 = por %p838_p7, %p837_p5 }
  0x3f   : > { %v1137_v29 = vld [vmem:[%s1015_s30 + $0xe8] sm:$0xff]  ;;  %v1142_v30 = vld [vmem:[%s1015_s30 + $0xf0] sm:$0xff]  ;;  %v1145_v31 = vld [vmem:[%s1015_s30 + $0xf8] sm:$0xff] }
  0x40   : > { %p840_p10 = pnand %p839_p8, %p833_p4 }
  0x42   : > { %181 = vmax.xlane.f32.xlu0 %v1046_v6  ;;  %183 = vmax.xlane.f32.xlu1 %v1049_v7 }
  0x46   : > { %185 = vmax.xlane.f32.xlu0 %v1054_v8  ;;  %187 = vmax.xlane.f32.xlu1 %v1057_v9 }
  0x4a   : > { %189 = vmax.xlane.f32.xlu0 %v1062_v10  ;;  %191 = vmax.xlane.f32.xlu1 %v1065_v11 }
  0x4e   : > { %193 = vmax.xlane.f32.xlu0 %v1070_v12  ;;  %195 = vmax.xlane.f32.xlu1 %v1073_v13 }
  0x52   : > { %197 = vmax.xlane.f32.xlu0 %v1078_v14  ;;  %199 = vmax.xlane.f32.xlu1 %v1081_v15 }
  0x56   : > { %201 = vmax.xlane.f32.xlu0 %v1086_v16  ;;  %203 = vmax.xlane.f32.xlu1 %v1089_v17 }
  0x5a   : > { %205 = vmax.xlane.f32.xlu0 %v1094_v18  ;;  %207 = vmax.xlane.f32.xlu1 %v1097_v19 }
  0x5e   : > { %209 = vmax.xlane.f32.xlu0 %v1102_v20  ;;  %211 = vmax.xlane.f32.xlu1 %v1105_v21 }
  0x62   : > { %213 = vmax.xlane.f32.xlu0 %v1110_v22  ;;  %215 = vmax.xlane.f32.xlu1 %v1113_v23 }
  0x66   : > { %217 = vmax.xlane.f32.xlu0 %v1118_v24  ;;  %219 = vmax.xlane.f32.xlu1 %v1121_v25 }
  0x6a   : > { %221 = vmax.xlane.f32.xlu0 %v1126_v26  ;;  %223 = vmax.xlane.f32.xlu1 %v1129_v27 }
  0x6e   : > { %225 = vmax.xlane.f32.xlu0 %v1134_v28  ;;  %227 = vmax.xlane.f32.xlu1 %v1137_v29 }
  0x72   : > { %229 = vmax.xlane.f32.xlu0 %v1142_v30  ;;  %231 = vmax.xlane.f32.xlu1 %v1145_v31 }
  0xbf   : > { %v170_v32 = vpop.xlane.xlu0 %169  ;;  %v174_v33 = vpop.xlane.xlu1 %173 }
  0xc0   : > { %v1150_v34 = vsub.f32 %v1022_v0, %v170_v32  ;;  %v1153_v35 = vsub.f32 %v1025_v1, %v174_v33 }
  0xc2   : > { %v265_v36 = vmul.f32 1.442695, %v1150_v34  ;;  %v269_v37 = vmul.f32 1.442695, %v1153_v35 }
  0xc3   : > { %v172_v38 = vpop.xlane.xlu0 %171  ;;  %v176_v39 = vpop.xlane.xlu1 %175 }
  0xc4   : > { %674 = vpow2.f32 %v265_v36  ;;  %v1158_v40 = vsub.f32 %v1030_v2, %v172_v38  ;;  %v1161_v41 = vsub.f32 %v1033_v3, %v176_v39 }
  0xc5   : > { %676 = vpow2.f32 %v269_v37 }
  0xc6   : > { %v267_v42 = vmul.f32 1.442695, %v1158_v40  ;;  %v271_v43 = vmul.f32 1.442695, %v1161_v41 }
  0xc7   : > { %v178_v44 = vpop.xlane.xlu0 %177  ;;  %v180_v45 = vpop.xlane.xlu1 %179 }
  0xc8   : > { %678 = vpow2.f32 %v267_v42  ;;  %v1166_v46 = vsub.f32 %v1038_v4, %v178_v44  ;;  %v1169_v47 = vsub.f32 %v1041_v5, %v180_v45 }
  0xc9   : > { %680 = vpow2.f32 %v271_v43 }
  0xca   : > { %v273_v48 = vmul.f32 1.442695, %v1166_v46  ;;  %v275_v49 = vmul.f32 1.442695, %v1169_v47 }
  0xcb   : > { %v182_v50 = vpop.xlane.xlu0 %181  ;;  %v184_v51 = vpop.xlane.xlu1 %183 }
  0xcc   : > { %682 = vpow2.f32 %v273_v48  ;;  %v1174_v52 = vsub.f32 %v1046_v6, %v182_v50  ;;  %v1177_v53 = vsub.f32 %v1049_v7, %v184_v51 }
  0xcd   : > { %684 = vpow2.f32 %v275_v49 }
  0xce   : > { %v277_v54 = vmul.f32 1.442695, %v1174_v52  ;;  %v279_v55 = vmul.f32 1.442695, %v1177_v53 }
  0xcf   : > { %v186_v56 = vpop.xlane.xlu0 %185  ;;  %v188_v57 = vpop.xlane.xlu1 %187 }
  0xd0   : > { %686 = vpow2.f32 %v277_v54  ;;  %v1182_v58 = vsub.f32 %v1054_v8, %v186_v56  ;;  %v1185_v59 = vsub.f32 %v1057_v9, %v188_v57 }
  0xd1   : > { %v675_v60 = vpop.eup %674  ;;  %688 = vpow2.f32 %v279_v55 }
  0xd2   : > { %v281_v61 = vmul.f32 1.442695, %v1182_v58  ;;  %329 = vadd.xlane.f32.xlu0 %v675_v60  ;;  %v283_v62 = vmul.f32 1.442695, %v1185_v59  ;;  %v677_v63 = vpop.eup %676 }
  0xd3   : > { %v190_v0 = vpop.xlane.xlu0 %189  ;;  %v192_v1 = vpop.xlane.xlu1 %191 }
  0xd4   : > { %690 = vpow2.f32 %v281_v61  ;;  %v1190_v2 = vsub.f32 %v1062_v10, %v190_v0  ;;  %v1193_v3 = vsub.f32 %v1065_v11, %v192_v1 }
  0xd5   : > { %v679_v4 = vpop.eup %678  ;;  %692 = vpow2.f32 %v283_v62 }
  0xd6   : > { %v285_v5 = vmul.f32 1.442695, %v1190_v2  ;;  %333 = vadd.xlane.f32.xlu0 %v677_v63  ;;  %331 = vadd.xlane.f32.xlu1 %v679_v4  ;;  %v287_v6 = vmul.f32 1.442695, %v1193_v3  ;;  %v681_v7 = vpop.eup %680 }
  0xd7   : > { %v194_v8 = vpop.xlane.xlu0 %193  ;;  %v196_v9 = vpop.xlane.xlu1 %195 }
  0xd8   : > { %694 = vpow2.f32 %v285_v5  ;;  %v1198_v32 = vsub.f32 %v1070_v12, %v194_v8  ;;  %v1201_v10 = vsub.f32 %v1073_v13, %v196_v9 }
  0xd9   : > { %v683_v11 = vpop.eup %682  ;;  %696 = vpow2.f32 %v287_v6 }
  0xda   : > { %v289_v33 = vmul.f32 1.442695, %v1198_v32  ;;  %335 = vadd.xlane.f32.xlu1 %v681_v7  ;;  %337 = vadd.xlane.f32.xlu0 %v683_v11  ;;  %v291_v36 = vmul.f32 1.442695, %v1201_v10  ;;  %v685_v37 = vpop.eup %684 }
  0xdb   : > { %v198_v38 = vpop.xlane.xlu0 %197  ;;  %v200_v39 = vpop.xlane.xlu1 %199 }
  0xdc   : > { %698 = vpow2.f32 %v289_v33  ;;  %v1206_v42 = vsub.f32 %v1078_v14, %v198_v38  ;;  %v1209_v12 = vsub.f32 %v1081_v15, %v200_v39 }
  0xdd   : > { %v687_v13 = vpop.eup %686  ;;  %700 = vpow2.f32 %v291_v36 }
  0xde   : > { %v293_v43 = vmul.f32 1.442695, %v1206_v42  ;;  %339 = vadd.xlane.f32.xlu1 %v685_v37  ;;  %341 = vadd.xlane.f32.xlu0 %v687_v13  ;;  %v295_v44 = vmul.f32 1.442695, %v1209_v12  ;;  %v689_v45 = vpop.eup %688 }
  0xdf   : > { %v202_v48 = vpop.xlane.xlu0 %201  ;;  %v204_v49 = vpop.xlane.xlu1 %203 }
  0xe0   : > { %702 = vpow2.f32 %v293_v43  ;;  %v1214_v50 = vsub.f32 %v1086_v16, %v202_v48  ;;  %v1217_v14 = vsub.f32 %v1089_v17, %v204_v49 }
  0xe1   : > { %v691_v15 = vpop.eup %690  ;;  %704 = vpow2.f32 %v295_v44 }
  0xe2   : > { %v297_v51 = vmul.f32 1.442695, %v1214_v50  ;;  %343 = vadd.xlane.f32.xlu1 %v689_v45  ;;  %345 = vadd.xlane.f32.xlu0 %v691_v15  ;;  %v299_v54 = vmul.f32 1.442695, %v1217_v14  ;;  %v693_v55 = vpop.eup %692 }
  0xe3   : > { %v206_v56 = vpop.xlane.xlu0 %205  ;;  %v208_v57 = vpop.xlane.xlu1 %207 }
  0xe4   : > { %706 = vpow2.f32 %v297_v51  ;;  %v1222_v60 = vsub.f32 %v1094_v18, %v206_v56  ;;  %v1225_v16 = vsub.f32 %v1097_v19, %v208_v57 }
  0xe5   : > { %v695_v17 = vpop.eup %694  ;;  %708 = vpow2.f32 %v299_v54 }
  0xe6   : > { %v301_v61 = vmul.f32 1.442695, %v1222_v60  ;;  %347 = vadd.xlane.f32.xlu1 %v693_v55  ;;  %349 = vadd.xlane.f32.xlu0 %v695_v17  ;;  %v303_v62 = vmul.f32 1.442695, %v1225_v16  ;;  %v697_v63 = vpop.eup %696 }
  0xe7   : > { %v210_v0 = vpop.xlane.xlu0 %209  ;;  %v212_v1 = vpop.xlane.xlu1 %211 }
  0xe8   : > { %710 = vpow2.f32 %v301_v61  ;;  %v1230_v4 = vsub.f32 %v1102_v20, %v210_v0  ;;  %v1233_v18 = vsub.f32 %v1105_v21, %v212_v1 }
  0xe9   : > { %v699_v19 = vpop.eup %698  ;;  %712 = vpow2.f32 %v303_v62 }
  0xea   : > { %v305_v5 = vmul.f32 1.442695, %v1230_v4  ;;  %351 = vadd.xlane.f32.xlu1 %v697_v63  ;;  %353 = vadd.xlane.f32.xlu0 %v699_v19  ;;  %v307_v6 = vmul.f32 1.442695, %v1233_v18  ;;  %v701_v7 = vpop.eup %700 }
  0xeb   : > { %v214_v8 = vpop.xlane.xlu0 %213  ;;  %v216_v9 = vpop.xlane.xlu1 %215 }
  0xec   : > { %714 = vpow2.f32 %v305_v5  ;;  %v1238_v11 = vsub.f32 %v1110_v22, %v214_v8  ;;  %v1241_v20 = vsub.f32 %v1113_v23, %v216_v9 }
  0xed   : > { %v703_v21 = vpop.eup %702  ;;  %716 = vpow2.f32 %v307_v6 }
  0xee   : > { %v309_v33 = vmul.f32 1.442695, %v1238_v11  ;;  %355 = vadd.xlane.f32.xlu1 %v701_v7  ;;  %357 = vadd.xlane.f32.xlu0 %v703_v21  ;;  %v311_v36 = vmul.f32 1.442695, %v1241_v20  ;;  %v705_v37 = vpop.eup %704 }
  0xef   : > { %v218_v38 = vpop.xlane.xlu0 %217  ;;  %v220_v39 = vpop.xlane.xlu1 %219 }
  0xf0   : > { %718 = vpow2.f32 %v309_v33  ;;  %v1246_v13 = vsub.f32 %v1118_v24, %v218_v38  ;;  %v1249_v22 = vsub.f32 %v1121_v25, %v220_v39 }
  0xf1   : > { %v707_v23 = vpop.eup %706  ;;  %720 = vpow2.f32 %v311_v36 }
  0xf2   : > { %v313_v43 = vmul.f32 1.442695, %v1246_v13  ;;  %359 = vadd.xlane.f32.xlu1 %v705_v37  ;;  %361 = vadd.xlane.f32.xlu0 %v707_v23  ;;  %v315_v44 = vmul.f32 1.442695, %v1249_v22  ;;  %v709_v45 = vpop.eup %708 }
  0xf3   : > { %v222_v48 = vpop.xlane.xlu0 %221  ;;  %v224_v49 = vpop.xlane.xlu1 %223 }
  0xf4   : > { %722 = vpow2.f32 %v313_v43  ;;  %v1254_v15 = vsub.f32 %v1126_v26, %v222_v48  ;;  %v1257_v24 = vsub.f32 %v1129_v27, %v224_v49 }
  0xf5   : > { %v711_v25 = vpop.eup %710  ;;  %724 = vpow2.f32 %v315_v44 }
  0xf6   : > { %v317_v51 = vmul.f32 1.442695, %v1254_v15  ;;  %363 = vadd.xlane.f32.xlu1 %v709_v45  ;;  %365 = vadd.xlane.f32.xlu0 %v711_v25  ;;  %v319_v54 = vmul.f32 1.442695, %v1257_v24  ;;  %v713_v55 = vpop.eup %712 }
  0xf7   : > { %v226_v56 = vpop.xlane.xlu0 %225  ;;  %v228_v57 = vpop.xlane.xlu1 %227 }
  0xf8   : > { %726 = vpow2.f32 %v317_v51  ;;  %v1262_v17 = vsub.f32 %v1134_v28, %v226_v56  ;;  %v1265_v26 = vsub.f32 %v1137_v29, %v228_v57 }
  0xf9   : > { %v715_v27 = vpop.eup %714  ;;  %728 = vpow2.f32 %v319_v54 }
  0xfa   : > { %v321_v61 = vmul.f32 1.442695, %v1262_v17  ;;  %367 = vadd.xlane.f32.xlu1 %v713_v55  ;;  %369 = vadd.xlane.f32.xlu0 %v715_v27  ;;  %v323_v62 = vmul.f32 1.442695, %v1265_v26  ;;  %v717_v63 = vpop.eup %716 }
  0xfb   : > { %v230_v0 = vpop.xlane.xlu0 %229  ;;  %v232_v1 = vpop.xlane.xlu1 %231 }
  0xfc   : > { %730 = vpow2.f32 %v321_v61  ;;  %v1270_v19 = vsub.f32 %v1142_v30, %v230_v0  ;;  %v1273_v28 = vsub.f32 %v1145_v31, %v232_v1 }
  0xfd   : > { %v719_v29 = vpop.eup %718  ;;  %732 = vpow2.f32 %v323_v62 }
  0xfe   : > { %v325_v5 = vmul.f32 1.442695, %v1270_v19  ;;  %371 = vadd.xlane.f32.xlu1 %v717_v63  ;;  %373 = vadd.xlane.f32.xlu0 %v719_v29  ;;  %v327_v6 = vmul.f32 1.442695, %v1273_v28  ;;  %v721_v7 = vpop.eup %720 }
 0x100   : > { %734 = vpow2.f32 %v325_v5 }
 0x101   : > { %v723_v8 = vpop.eup %722  ;;  %736 = vpow2.f32 %v327_v6 }
 0x102   : > { %375 = vadd.xlane.f32.xlu1 %v721_v7  ;;  %377 = vadd.xlane.f32.xlu0 %v723_v8  ;;  %v725_v9 = vpop.eup %724 }
 0x105   : > { %v727_v30 = vpop.eup %726 }
 0x106   : > { %379 = vadd.xlane.f32.xlu1 %v725_v9  ;;  %381 = vadd.xlane.f32.xlu0 %v727_v30  ;;  %v729_v31 = vpop.eup %728 }
 0x109   : > { %v731_v21 = vpop.eup %730 }
 0x10a   : > { %383 = vadd.xlane.f32.xlu1 %v729_v31  ;;  %385 = vadd.xlane.f32.xlu0 %v731_v21  ;;  %v733_v33 = vpop.eup %732 }
 0x10d   : > { %v735_v36 = vpop.eup %734 }
 0x10e   : > { %387 = vadd.xlane.f32.xlu1 %v733_v33  ;;  %389 = vadd.xlane.f32.xlu0 %v735_v36  ;;  %v737_v37 = vpop.eup %736 }
 0x112   : > { %391 = vadd.xlane.f32.xlu1 %v737_v37 }
 0x15b   : > { %v330_v38 = vpop.xlane.xlu0 %329 }
 0x15c   : > { %738 = vlog2.f32 %v330_v38 }
 0x15f   : > { %v332_v39 = vpop.xlane.xlu1 %331  ;;  %v334_v23 = vpop.xlane.xlu0 %333 }
 0x160   : > { %740 = vlog2.f32 %v332_v39 }
 0x161   : > { %742 = vlog2.f32 %v334_v23 }
 0x163   : > { %v336_v43 = vpop.xlane.xlu1 %335  ;;  %v338_v44 = vpop.xlane.xlu0 %337 }
 0x164   : > { %744 = vlog2.f32 %v336_v43 }
 0x165   : > { %746 = vlog2.f32 %v338_v44 }
 0x167   : > { %v340_v45 = vpop.xlane.xlu1 %339  ;;  %v342_v48 = vpop.xlane.xlu0 %341 }
 0x168   : > { %748 = vlog2.f32 %v340_v45 }
 0x169   : > { %v739_v49 = vpop.eup %738  ;;  %750 = vlog2.f32 %v342_v48 }
 0x16a   : > { %v394_v25 = vmul.f32 0.6931472, %v739_v49 }
 0x16b   : > { %v344_v51 = vpop.xlane.xlu1 %343  ;;  %v346_v54 = vpop.xlane.xlu0 %345 }
 0x16c   : > { %v457_v55 = vsub.f32 %v1150_v34, %v394_v25  ;;  %752 = vlog2.f32 %v344_v51 }
 0x16d   : > { %v741_v56 = vpop.eup %740  ;;  %754 = vlog2.f32 %v346_v54 }
 0x16e   : > { %v743_v57 = vpop.eup %742  ;;  %489 = vst [vmem:[%s1280_s17] sm:$0xff] %v457_v55  ;;  %v396_v27 = vmul.f32 0.6931472, %v741_v56 }
 0x16f   : > { %v398_v61 = vmul.f32 0.6931472, %v743_v57  ;;  %v348_v62 = vpop.xlane.xlu1 %347  ;;  %v350_v63 = vpop.xlane.xlu0 %349 }
 0x170   : > { %v458_v0 = vsub.f32 %v1158_v40, %v396_v27  ;;  %756 = vlog2.f32 %v348_v62 }
 0x171   : > { %v745_v1 = vpop.eup %744  ;;  %v459_v34 = vsub.f32 %v1153_v35, %v398_v61  ;;  %758 = vlog2.f32 %v350_v63 }
 0x172   : > { %v747_v29 = vpop.eup %746  ;;  %490 = vst [vmem:[%s1280_s17 + $0x8] sm:$0xff] %v458_v0  ;;  %v400_v5 = vmul.f32 0.6931472, %v745_v1 }
 0x173   : > { %491 = vst [vmem:[%s1280_s17 + $0x10] sm:$0xff] %v459_v34  ;;  %v402_v6 = vmul.f32 0.6931472, %v747_v29  ;;  %v352_v7 = vpop.xlane.xlu1 %351  ;;  %v354_v8 = vpop.xlane.xlu0 %353 }
 0x174   : > { %v460_v9 = vsub.f32 %v1161_v41, %v400_v5  ;;  %760 = vlog2.f32 %v352_v7 }
 0x175   : > { %v749_v30 = vpop.eup %748  ;;  %v461_v40 = vsub.f32 %v1166_v46, %v402_v6  ;;  %762 = vlog2.f32 %v354_v8 }
 0x176   : > { %v751_v31 = vpop.eup %750  ;;  %492 = vst [vmem:[%s1280_s17 + $0x18] sm:$0xff] %v460_v9  ;;  %v404_v35 = vmul.f32 0.6931472, %v749_v30 }
 0x177   : > { %493 = vst [vmem:[%s1280_s17 + $0x20] sm:$0xff] %v461_v40  ;;  %v406_v21 = vmul.f32 0.6931472, %v751_v31  ;;  %v356_v33 = vpop.xlane.xlu1 %355  ;;  %v358_v36 = vpop.xlane.xlu0 %357 }
 0x178   : > { %v462_v37 = vsub.f32 %v1169_v47, %v404_v35  ;;  %764 = vlog2.f32 %v356_v33 }
 0x179   : > { %v753_v38 = vpop.eup %752  ;;  %v463_v41 = vsub.f32 %v1174_v52, %v406_v21  ;;  %766 = vlog2.f32 %v358_v36 }
 0x17a   : > { %v755_v39 = vpop.eup %754  ;;  %494 = vst [vmem:[%s1280_s17 + $0x28] sm:$0xff] %v462_v37  ;;  %v408_v46 = vmul.f32 0.6931472, %v753_v38 }
 0x17b   : > { %495 = vst [vmem:[%s1280_s17 + $0x30] sm:$0xff] %v463_v41  ;;  %v410_v23 = vmul.f32 0.6931472, %v755_v39  ;;  %v360_v43 = vpop.xlane.xlu1 %359  ;;  %v362_v44 = vpop.xlane.xlu0 %361 }
 0x17c   : > { %v464_v45 = vsub.f32 %v1177_v53, %v408_v46  ;;  %768 = vlog2.f32 %v360_v43 }
 0x17d   : > { %v757_v48 = vpop.eup %756  ;;  %v465_v47 = vsub.f32 %v1182_v58, %v410_v23  ;;  %770 = vlog2.f32 %v362_v44 }
 0x17e   : > { %v759_v49 = vpop.eup %758  ;;  %496 = vst [vmem:[%s1280_s17 + $0x38] sm:$0xff] %v464_v45  ;;  %v412_v52 = vmul.f32 0.6931472, %v757_v48 }
 0x17f   : > { %497 = vst [vmem:[%s1280_s17 + $0x40] sm:$0xff] %v465_v47  ;;  %v414_v25 = vmul.f32 0.6931472, %v759_v49  ;;  %v364_v51 = vpop.xlane.xlu1 %363  ;;  %v366_v54 = vpop.xlane.xlu0 %365 }
 0x180   : > { %v466_v55 = vsub.f32 %v1185_v59, %v412_v52  ;;  %772 = vlog2.f32 %v364_v51 }
 0x181   : > { %v761_v56 = vpop.eup %760  ;;  %v467_v53 = vsub.f32 %v1190_v2, %v414_v25  ;;  %774 = vlog2.f32 %v366_v54 }
 0x182   : > { %v763_v57 = vpop.eup %762  ;;  %498 = vst [vmem:[%s1280_s17 + $0x48] sm:$0xff] %v466_v55  ;;  %v416_v58 = vmul.f32 0.6931472, %v761_v56 }
 0x183   : > { %499 = vst [vmem:[%s1280_s17 + $0x50] sm:$0xff] %v467_v53  ;;  %v418_v27 = vmul.f32 0.6931472, %v763_v57  ;;  %v368_v61 = vpop.xlane.xlu1 %367  ;;  %v370_v62 = vpop.xlane.xlu0 %369 }
 0x184   : > { %v468_v63 = vsub.f32 %v1193_v3, %v416_v58  ;;  %776 = vlog2.f32 %v368_v61 }
 0x185   : > { %v765_v0 = vpop.eup %764  ;;  %v469_v59 = vsub.f32 %v1198_v32, %v418_v27  ;;  %778 = vlog2.f32 %v370_v62 }
 0x186   : > { %v767_v1 = vpop.eup %766  ;;  %500 = vst [vmem:[%s1280_s17 + $0x58] sm:$0xff] %v468_v63  ;;  %v420_v2 = vmul.f32 0.6931472, %v765_v0 }
 0x187   : > { %501 = vst [vmem:[%s1280_s17 + $0x60] sm:$0xff] %v469_v59  ;;  %v422_v34 = vmul.f32 0.6931472, %v767_v1  ;;  %v372_v29 = vpop.xlane.xlu1 %371  ;;  %v374_v5 = vpop.xlane.xlu0 %373 }
 0x188   : > { %v470_v6 = vsub.f32 %v1201_v10, %v420_v2  ;;  %780 = vlog2.f32 %v372_v29 }
 0x189   : > { %v769_v7 = vpop.eup %768  ;;  %v471_v3 = vsub.f32 %v1206_v42, %v422_v34  ;;  %782 = vlog2.f32 %v374_v5 }
 0x18a   : > { %v771_v8 = vpop.eup %770  ;;  %502 = vst [vmem:[%s1280_s17 + $0x68] sm:$0xff] %v470_v6  ;;  %v424_v32 = vmul.f32 0.6931472, %v769_v7 }
 0x18b   : > { %503 = vst [vmem:[%s1280_s17 + $0x70] sm:$0xff] %v471_v3  ;;  %v426_v9 = vmul.f32 0.6931472, %v771_v8  ;;  %v376_v30 = vpop.xlane.xlu1 %375  ;;  %v378_v40 = vpop.xlane.xlu0 %377 }
 0x18c   : > { %v472_v31 = vsub.f32 %v1209_v12, %v424_v32  ;;  %784 = vlog2.f32 %v376_v30 }
 0x18d   : > { %v773_v35 = vpop.eup %772  ;;  %v473_v10 = vsub.f32 %v1214_v50, %v426_v9  ;;  %786 = vlog2.f32 %v378_v40 }
 0x18e   : > { %v775_v21 = vpop.eup %774  ;;  %504 = vst [vmem:[%s1280_s17 + $0x78] sm:$0xff] %v472_v31  ;;  %v428_v42 = vmul.f32 0.6931472, %v773_v35 }
 0x18f   : > { %505 = vst [vmem:[%s1280_s17 + $0x80] sm:$0xff] %v473_v10  ;;  %v430_v33 = vmul.f32 0.6931472, %v775_v21  ;;  %v380_v36 = vpop.xlane.xlu1 %379  ;;  %v382_v37 = vpop.xlane.xlu0 %381 }
 0x190   : > { %v474_v38 = vsub.f32 %v1217_v14, %v428_v42  ;;  %788 = vlog2.f32 %v380_v36 }
 0x191   : > { %v777_v41 = vpop.eup %776  ;;  %v475_v12 = vsub.f32 %v1222_v60, %v430_v33  ;;  %790 = vlog2.f32 %v382_v37 }
 0x192   : > { %v779_v39 = vpop.eup %778  ;;  %506 = vst [vmem:[%s1280_s17 + $0x88] sm:$0xff] %v474_v38  ;;  %v432_v50 = vmul.f32 0.6931472, %v777_v41 }
 0x193   : > { %507 = vst [vmem:[%s1280_s17 + $0x90] sm:$0xff] %v475_v12  ;;  %v434_v46 = vmul.f32 0.6931472, %v779_v39  ;;  %v384_v23 = vpop.xlane.xlu1 %383  ;;  %v386_v43 = vpop.xlane.xlu0 %385 }
 0x194   : > { %v476_v44 = vsub.f32 %v1225_v16, %v432_v50  ;;  %792 = vlog2.f32 %v384_v23 }
 0x195   : > { %v781_v45 = vpop.eup %780  ;;  %v477_v14 = vsub.f32 %v1230_v4, %v434_v46  ;;  %794 = vlog2.f32 %v386_v43 }
 0x196   : > { %v783_v48 = vpop.eup %782  ;;  %508 = vst [vmem:[%s1280_s17 + $0x98] sm:$0xff] %v476_v44  ;;  %v436_v60 = vmul.f32 0.6931472, %v781_v45 }
 0x197   : > { %509 = vst [vmem:[%s1280_s17 + $0xa0] sm:$0xff] %v477_v14  ;;  %v438_v47 = vmul.f32 0.6931472, %v783_v48  ;;  %v388_v49 = vpop.xlane.xlu1 %387  ;;  %v390_v52 = vpop.xlane.xlu0 %389 }
 0x198   : > { %v478_v25 = vsub.f32 %v1233_v18, %v436_v60  ;;  %796 = vlog2.f32 %v388_v49 }
 0x199   : > { %v785_v51 = vpop.eup %784  ;;  %v479_v16 = vsub.f32 %v1238_v11, %v438_v47  ;;  %798 = vlog2.f32 %v390_v52 }
 0x19a   : > { %v787_v54 = vpop.eup %786  ;;  %510 = vst [vmem:[%s1280_s17 + $0xa8] sm:$0xff] %v478_v25  ;;  %v440_v4 = vmul.f32 0.6931472, %v785_v51 }
 0x19b   : > { %511 = vst [vmem:[%s1280_s17 + $0xb0] sm:$0xff] %v479_v16  ;;  %v442_v55 = vmul.f32 0.6931472, %v787_v54  ;;  %v392_v56 = vpop.xlane.xlu1 %391 }
 0x19c   : > { %v480_v53 = vsub.f32 %v1241_v20, %v440_v4  ;;  %800 = vlog2.f32 %v392_v56 }
 0x19d   : > { %v789_v57 = vpop.eup %788  ;;  %v481_v18 = vsub.f32 %v1246_v13, %v442_v55 }
 0x19e   : > { %v791_v58 = vpop.eup %790  ;;  %512 = vst [vmem:[%s1280_s17 + $0xb8] sm:$0xff] %v480_v53  ;;  %v444_v27 = vmul.f32 0.6931472, %v789_v57 }
 0x19f   : > { %513 = vst [vmem:[%s1280_s17 + $0xc0] sm:$0xff] %v481_v18  ;;  %v446_v11 = vmul.f32 0.6931472, %v791_v58 }
 0x1a0   : > { %v482_v61 = vsub.f32 %v1249_v22, %v444_v27 }
 0x1a1   : > { %v793_v62 = vpop.eup %792  ;;  %v483_v63 = vsub.f32 %v1254_v15, %v446_v11 }
 0x1a2   : > { %v795_v0 = vpop.eup %794  ;;  %514 = vst [vmem:[%s1280_s17 + $0xc8] sm:$0xff] %v482_v61  ;;  %v448_v20 = vmul.f32 0.6931472, %v793_v62 }
 0x1a3   : > { %515 = vst [vmem:[%s1280_s17 + $0xd0] sm:$0xff] %v483_v63  ;;  %v450_v13 = vmul.f32 0.6931472, %v795_v0 }
 0x1a4   : > { %v484_v59 = vsub.f32 %v1257_v24, %v448_v20 }
 0x1a5   : > { %v797_v1 = vpop.eup %796  ;;  %v485_v2 = vsub.f32 %v1262_v17, %v450_v13 }
 0x1a6   : > { %v799_v34 = vpop.eup %798  ;;  %516 = vst [vmem:[%s1280_s17 + $0xd8] sm:$0xff] %v484_v59  ;;  %v452_v22 = vmul.f32 0.6931472, %v797_v1 }
 0x1a7   : > { %517 = vst [vmem:[%s1280_s17 + $0xe0] sm:$0xff] %v485_v2  ;;  %v454_v15 = vmul.f32 0.6931472, %v799_v34 }
 0x1a8   : > { %v486_v29 = vsub.f32 %v1265_v26, %v452_v22 }
 0x1a9   : > { %v801_v5 = vpop.eup %800  ;;  %v487_v6 = vsub.f32 %v1270_v19, %v454_v15 }
 0x1aa   : > { %518 = vst [vmem:[%s1280_s17 + $0xe8] sm:$0xff] %v486_v29  ;;  %v456_v24 = vmul.f32 0.6931472, %v801_v5 }
 0x1ab   : > { %519 = vst [vmem:[%s1280_s17 + $0xf0] sm:$0xff] %v487_v6 }
 0x1ac   : > { %v488_v17 = vsub.f32 %v1273_v28, %v456_v24 }
 0x1ae   : > { %520 = vst [vmem:[%s1280_s17 + $0xf8] sm:$0xff] %v488_v17 }
 0x1af   : > { %843 = shalt.err (!%p840_p10)
}
 0x1b0   : > { %s844_s13 = scalar_lea.hbm %s1348_s2, 4096  ;;  %s848_s20 = scalar_lea.hbm %s1396_s1, 8192 }
 0x1b1   : > { %p845_p0 = scmp.ne.s32.totalorder %s1348_s2, %s844_s13  ;;  %p849_p1 = scmp.lt.s32.totalorder %s1348_s2, %s1396_s1 }
 0x1b2   : > { %p850_p3 = scmp.lt.s32.totalorder %s848_s20, %s844_s13 }
 0x1b3   : > { %p846_p2 = pnand %p845_p0, %p1405_p12 }
 0x1b4   : > { %p851_p6 = por %p850_p3, %p849_p1 }
 0x1b5   : > { %p847_p9 = pneg %p846_p2 }
 0x1b7   : > { %p852_p11 = pnand %p851_p6, %p847_p9 }
 0x1b9   : > { %855 = shalt.err (!%p852_p11)
}
 0x1ba   : > { %s900_s24 = smov 128   ;;  %s901_s26 = smov 8  }
 0x1bb   : > { %626 = dma.vmem_to_hbm [thread:$0]  (%p1405_p12), %s1350_s27, 4096, %s1348_s2, %s522_s10, %s900_s24, %s900_s24, %s901_s26  }
 0x1bc PF: > { %s550_s30 = sand.u32 1, %s882_s6   ;;  %p1406_p13 = scmp.ne.s32.totalorder %s1402_s19, 0 }
 0x1bd   : > { %p1407_p4 = scmp.ge.s32.totalorder %s894_s9, 2  ;;  %s551_s17 = scalar_lea.sflag [#allocation4], %s550_s30 }
 0x1bf   : > { %p633_p5 = pnand %p1407_p4, %p1406_p13 }
 0x1c1   : > { %p634_p7 = pneg %p633_p5 }
 0x1c3   : > { %877 = dma.done.wait (%p634_p7), %s551_s17, 4096  }
 0x1c4   : > { %879 = vsyncadd (%p634_p7), %s551_s17, 4294963200  ;;  %p14_p8 = scmp.ge.s32.totalorder %s937_s12, 4   ;;  %s1408_s6 = smov %s886_s7 }
 0x1c5   : > { %s1409_s7 = smov %s890_s8  ;;  %s1410_s8 = smov %s949_s15 }
 0x1c6   : > { %s1411_s9 = smov %s937_s12  ;;  %16 = sbr.rel (!%p14_p8) target bundleno = 5 (0x5), region = 69 }
 0x1cb   :  { %556 = vsyncpa [#allocation3], 1 }
 0x1cc   :  { %558 = vsyncpa [#allocation3 + $0x1], 1 }
 0x1cd   :  { %559 = vsyncpa [#allocation4], 1 }
 0x1ce   :  { %561 = vsyncpa [#allocation4 + $0x1], 1 }

</bundles_post_ra>
